<compile_context>
chip_gen: v6e
topology: v6e:2x2x1
jax: 0.10.0
libtpu: 0.0.40
codegen_flags: <defaults>
</compile_context>

<pallas_src>
import math

import jax
import jax.numpy as jnp
from jax.experimental import pallas as pl
from jax.experimental.pallas import tpu as pltpu


def _linear_kernel(x_ref, w_ref, b_ref, o_ref):
    # y = x @ W_packed + b_packed   (W_packed already [K, N_out_packed])
    acc = jnp.dot(x_ref[...], w_ref[...], preferred_element_type=jnp.float32)
    o_ref[...] = (acc + b_ref[...].astype(jnp.float32)).astype(o_ref.dtype)


def _choose_pack(out_dim, max_pack=8):
    """Logical rows packed per kernel row so the output last dim is a multiple
    of 128 (dense 128-lane vst instead of masked vst.msk).

    Keep pack small: wasted block-diagonal MXU FLOPs grow as pack**2 and the
    kernel must stay HBM-bandwidth-bound on all generations.  Do NOT enlarge
    pack just to make the *input* lane-dense.
    """
    if out_dim >= 128:
        return 1
    p = math.lcm(out_dim, 128) // out_dim
    return p if p <= max_pack else 1


def prepare_point_embedding_params(weight, bias):
    """One-time parameter prep (call OUTSIDE the hot path).

    weight: [output_dim, input_dim]  (PyTorch nn.Linear convention)
    bias:   [output_dim]
    Returns (w_packed [pack*in, pack*out], b_packed [1, pack*out], pack).
    """
    out_dim, in_dim = weight.shape
    pack = _choose_pack(out_dim)

    w_t = jnp.transpose(weight)                 # [in, out]
    if pack > 1:
        # Block-diagonal weight: diagonal blocks are W^T.  The extra zero
        # FLOPs are free (MXU has huge slack at these K); output stores
        # become 128-lane dense.
        eye = jnp.eye(pack, dtype=weight.dtype)
        w_packed = jnp.einsum("pq,io->piqo", eye, w_t).reshape(
            pack * in_dim, pack * out_dim)
        b_packed = jnp.tile(bias, pack).reshape(1, pack * out_dim)
    else:
        w_packed = w_t
        b_packed = bias.reshape(1, out_dim)
    return w_packed, b_packed, pack


def _pick_tile(n_rows, tile_m):
    """Row-tile choice: never collapse to one grid step for non-tiny inputs."""
    if n_rows <= 512:
        return n_rows                            # genuinely tiny: full extent
    target_steps = 8                             # keeps both v7x TCs + pipeline busy
    tile = -(-n_rows // target_steps)            # cdiv
    tile = ((tile + 15) // 16) * 16              # multiple of 16 (bf16-friendly)
    return max(16, min(tile, tile_m))


def point_embedding_cosy(x, w_packed, b_packed, pack, *, tile_m=8192,
                         out_dtype=None):
    """Forward of PointEmbedding_COSY: y = x @ W^T + b.

    x:        [..., input_dim]
    w_packed: [pack*input_dim, pack*output_dim]  (from prepare_...)
    b_packed: [1, pack*output_dim]
    out_dtype: optional output dtype (e.g. jnp.bfloat16 to halve write traffic).
    returns   [..., output_dim]
    """
    in_dim = x.shape[-1]
    k_dim, pn_out = w_packed.shape
    out_dim = pn_out // pack
    assert k_dim == pack * in_dim
    lead = x.shape[:-1]
    out_dtype = jnp.dtype(out_dtype) if out_dtype is not None else x.dtype

    x2d = x.reshape(-1, in_dim)                  # [N, in]
    n = x2d.shape[0]
    rem = n % pack
    n_main = n - rem

    parts = []
    if n_main:
        n_rows = n_main // pack
        xp = x2d[:n_main].reshape(n_rows, k_dim)  # fold pack rows -> one kernel row
        tile = _pick_tile(n_rows, tile_m)
        grid = (pl.cdiv(n_rows, tile),)

        in_elt = jnp.dtype(x.dtype).itemsize
        out_elt = jnp.dtype(out_dtype).itemsize
        cost = pl.CostEstimate(
            flops=2 * n_rows * k_dim * pn_out,    # actual padded-matmul work
            transcendentals=0,
            bytes_accessed=(in_elt * (xp.size + w_packed.size + b_packed.size)
                            + out_elt * n_rows * pn_out),
        )

        yp = pl.pallas_call(
            _linear_kernel,
            out_shape=jax.ShapeDtypeStruct((n_rows, pn_out), out_dtype),
            grid_spec=pltpu.PrefetchScalarGridSpec(
                num_scalar_prefetch=0,
                grid=grid,
                in_specs=[
                    pl.BlockSpec((tile, k_dim), lambda i: (i, 0)),
                    # Weight / bias are grid-invariant: single-buffer them.
                    pl.BlockSpec((k_dim, pn_out), lambda i: (0, 0),
                                 pipeline_mode=pl.Buffered(1)),
                    pl.BlockSpec((1, pn_out), lambda i: (0, 0),
                                 pipeline_mode=pl.Buffered(1)),
                ],
                out_specs=pl.BlockSpec((tile, pn_out), lambda i: (i, 0)),
            ),
            compiler_params=pltpu.CompilerParams(
                dimension_semantics=("parallel",),   # megacore split on v7x
                vmem_limit_bytes=48 << 20,           # big tiles OK on all gens
            ),
            cost_estimate=cost,
        )(xp, w_packed, b_packed)
        parts.append(yp.reshape(n_main, out_dim))

    if rem:
        # Ragged tail (< pack rows): avoid a full-array pad copy of x — a tiny
        # plain-JAX matmul on the leftover rows is cheaper than re-streaming x.
        w_t = w_packed[:in_dim, :out_dim]
        b = b_packed[0, :out_dim]
        tail = (x2d[n_main:].astype(jnp.float32) @ w_t.astype(jnp.float32)
                + b.astype(jnp.float32)).astype(out_dtype)
        parts.append(tail)

    y2d = parts[0] if len(parts) == 1 else jnp.concatenate(parts, axis=0)
    return y2d.reshape(*lead, out_dim)


if __name__ == "__main__":
    # Small shapes consistent with the module: points [batch, seq, input_dim]
    batch, seq, input_dim, output_dim = 2, 8, 4, 32

    key = jax.random.PRNGKey(0)
    kx, kw, kb, kx2 = jax.random.split(key, 4)

    # Deterministic parameter init mimicking nn.Linear default (U[-1/sqrt(in), 1/sqrt(in)])
    bound = 1.0 / jnp.sqrt(jnp.float32(input_dim))
    weight = jax.random.uniform(kw, (output_dim, input_dim), jnp.float32, -bound, bound)
    bias = jax.random.uniform(kb, (output_dim,), jnp.float32, -bound, bound)

    x = jax.random.normal(kx, (batch, seq, input_dim), jnp.float32)

    # One-time param prep (transpose + lane-packing), then the hot-path call.
    w_packed, b_packed, pack = prepare_point_embedding_params(weight, bias)
    y = point_embedding_cosy(x, w_packed, b_packed, pack)
    jax.block_until_ready(y)

    # Cross-check against plain JAX reference.
    y_ref = x @ weight.T + bias
    assert y.shape == (batch, seq, output_dim)
    assert jnp.allclose(y, y_ref, atol=1e-5, rtol=1e-5)

    # Ragged-N path (n % pack != 0): exercises the no-pad tail fallback.
    x_rag = jax.random.normal(kx2, (1, 7, input_dim), jnp.float32)
    y_rag = point_embedding_cosy(x_rag, w_packed, b_packed, pack)
    jax.block_until_ready(y_rag)
    y_rag_ref = x_rag @ weight.T + bias
    assert y_rag.shape == (1, 7, output_dim)
    assert jnp.allclose(y_rag, y_rag_ref, atol=1e-5, rtol=1e-5)

    print("KERNEL_OK")
</pallas_src>

<mosaic_0001>
module attributes {stable_mosaic.version = 11 : i64} {
  func.func @_linear_kernel(%arg0: i32, %arg1: memref<4x16xf32, #tpu.memory_space<vmem>>, %arg2: memref<16x128xf32, #tpu.memory_space<vmem>>, %arg3: memref<1x128xf32, #tpu.memory_space<vmem>>, %arg4: memref<4x128xf32, #tpu.memory_space<vmem>>) attributes {dimension_semantics = [#tpu.dimension_semantics<parallel>], iteration_bounds = array<i64: 1>, scalar_prefetch = 0 : i64, scratch_operands = 0 : i64, tpu.core_type = #tpu.core_type<tc>, window_params = [{transform_indices = @transform_0, window_bounds = array<i64: 4, 16>}, {pipeline_mode = #tpu.pipeline_mode<synchronous>, transform_indices = @transform_1, window_bounds = array<i64: 16, 128>}, {pipeline_mode = #tpu.pipeline_mode<synchronous>, transform_indices = @transform_2, window_bounds = array<i64: 1, 128>}, {transform_indices = @transform_3, window_bounds = array<i64: 4, 128>}]} {
    %c0 = arith.constant 0 : index
    %c0_0 = arith.constant 0 : index
    %0 = vector.load %arg1[%c0, %c0_0] : memref<4x16xf32, #tpu.memory_space<vmem>>, vector<4x16xf32>
    %c0_1 = arith.constant 0 : index
    %c0_2 = arith.constant 0 : index
    %1 = vector.load %arg2[%c0_1, %c0_2] : memref<16x128xf32, #tpu.memory_space<vmem>>, vector<16x128xf32>
    %cst = arith.constant dense<0.000000e+00> : vector<4x128xf32>
    %2 = tpu.matmul %0, %1, %cst {dimension_numbers = #tpu.dot_dimension_numbers<[1], [0], [0], [1], [0, 0, 1, 1], [], []>} : vector<4x16xf32>, vector<16x128xf32>, vector<4x128xf32> -> vector<4x128xf32>
    %c0_3 = arith.constant 0 : index
    %c0_4 = arith.constant 0 : index
    %3 = vector.load %arg3[%c0_3, %c0_4] : memref<1x128xf32, #tpu.memory_space<vmem>>, vector<1x128xf32>
    %4 = vector.broadcast %3 : vector<1x128xf32> to vector<4x128xf32>
    %5 = arith.addf %2, %4 : vector<4x128xf32>
    %c0_5 = arith.constant 0 : index
    %c0_6 = arith.constant 0 : index
    %6 = vector.load %arg4[%c0_5, %c0_6] : memref<4x128xf32, #tpu.memory_space<vmem>>, vector<4x128xf32>
    tpu.vector_store %arg4[%c0_5, %c0_6], %5 {strides = array<i32>} : memref<4x128xf32, #tpu.memory_space<vmem>>, vector<4x128xf32>,
    return
  }
  func.func @transform_0(%arg0: i32) -> (i32, i32) {
    %c0_i32 = arith.constant 0 : i32
    %c0_i32_0 = arith.constant 0 : i32
    return %arg0, %c0_i32 : i32, i32
  }
  func.func @transform_1(%arg0: i32) -> (i32, i32) {
    %c0_i32 = arith.constant 0 : i32
    %c0_i32_0 = arith.constant 0 : i32
    %c0_i32_1 = arith.constant 0 : i32
    return %c0_i32, %c0_i32_0 : i32, i32
  }
  func.func @transform_2(%arg0: i32) -> (i32, i32) {
    %c0_i32 = arith.constant 0 : i32
    %c0_i32_0 = arith.constant 0 : i32
    %c0_i32_1 = arith.constant 0 : i32
    return %c0_i32, %c0_i32_0 : i32, i32
  }
  func.func @transform_3(%arg0: i32) -> (i32, i32) {
    %c0_i32 = arith.constant 0 : i32
    %c0_i32_0 = arith.constant 0 : i32
    return %arg0, %c0_i32 : i32, i32
  }
}

</mosaic_0001>

<bundles_post_ra>
// kernel: tpu_custom_call.1
= control target key start
LH: loop header
LB: loop body
LE: loop exit
PB: predicated region body
PF: predicated region fallthrough
CT: control target
= control target key end

     0   :  { %8 = vsyncpa [#allocation3], 0  ;;  %s266_s0 = inlined_call_operand.hbm [shape: f32[4,16], index: 0, kind: input, shape index: {}]   ;;  %s267_s1 = inlined_call_operand.hbm [shape: f32[16,128], index: 1, kind: input, shape index: {}]   ;;  %s268_s2 = inlined_call_operand.vmem [shape: f32[1,128], index: 2, kind: input, shape index: {}]   ;;  %s269_s3 = inlined_call_operand.hbm [shape: f32[4,128], index: 3, kind: output, shape index: {}]  }
   0x1   :  { %9 = vsyncpa [#allocation6], 0 }
   0x2   :  { %10 = vsyncpa [#allocation4], 0  ;;  %s227_s12 = smov [#allocation2]   ;;  %s228_s14 = smov [#allocation5]  }
   0x3   :  { %s17_s13 = sshll.u32 %s227_s12, 4  ;;  %s26_s15 = sshll.u32 %s228_s14, 4  ;;  %s18_s13 = int_to_ptr.vmem [resolvable:$true] %s17_s13  ;;  %s27_s15 = int_to_ptr.vmem [resolvable:$true] %s26_s15 }
   0x4   :  { %s169_s16 = scalar_lea.vmem %s18_s13, 64  ;;  %p174_p1 = scmp.lt.s32.totalorder %s18_s13, %s18_s13 }
   0x5   :  { %p170_p0 = scmp.ne.s32.totalorder %s18_s13, %s169_s16  ;;  %p175_p2 = scmp.lt.s32.totalorder %s169_s16, %s169_s16 }
   0x7   :  { %p176_p3 = por %p175_p2, %p174_p1 }
   0x9   :  { %p177_p4 = pnand %p176_p3, %p170_p0 }
   0xb   :  { %180 = shalt.err (!%p177_p4)
}
   0xc   :  { %20 = dma.hbm_to_vmem [thread:$0]  %s266_s0, 64, %s18_s13, [#allocation3]  }
   0xd   :  { %s189_s19 = scalar_lea.vmem %s27_s15, 256  ;;  %p194_p6 = scmp.lt.s32.totalorder %s27_s15, %s27_s15 }
   0xe   :  { %p190_p5 = scmp.ne.s32.totalorder %s27_s15, %s189_s19  ;;  %p195_p7 = scmp.lt.s32.totalorder %s189_s19, %s189_s19 }
  0x10   :  { %p196_p8 = por %p195_p7, %p194_p6 }
  0x12   :  { %p197_p9 = pnand %p196_p8, %p190_p5 }
  0x14   :  { %200 = shalt.err (!%p197_p9)
}
  0x15   :  { %s229_s20 = smov 128   ;;  %s230_s21 = smov 8  }
  0x16   :  { %32 = dma.hbm_to_vmem [thread:$0]  %s267_s1, 256, %s27_s15, [#allocation6], %s229_s20, %s229_s20, %s230_s21  }
  0x17   :  { %221 = dma.done.wait [#allocation3], 64  }
  0x18   :  { %222 = vsyncadd [#allocation3], 4294967232 }
  0x19   :  { %223 = dma.done.wait [#allocation6], 256  }
  0x1a   :  { %224 = vsyncadd [#allocation6], 4294967040  ;;  %v231_v0 = vmov 0.0   ;;  %vm232_vm0 = vmmov 0   ;;  %v43_v1 = vld [vmem:[#allocation5 + $0x8] sm:$0xff]  ;;  %v42_v2 = vld [vmem:[#allocation5] sm:$0xff] }
  0x1b   :  { %147 = vmatprep.subr.mxu0 %v231_v0  ;;  %151 = vmatprep.mubr.msk.f32.mxu0 %vm232_vm0, %v231_v0  ;;  %v41_v3 = vld [vmem:[#allocation2] sm:$0xf]  ;;  %vm51_vm1 = vcmask 130048   ;;  %s233_s1 = smov [#allocation7]  }
  0x1c   :  { %148 = vmatpush3.msra.mxu0 %v43_v1  ;;  %v142_v4 = vld [vmem:[%s268_s2] ss:$0 sm:$0xff]  ;;  %s132_s25 = sshll.u32 %s233_s1, 4  ;;  %s133_s25 = int_to_ptr.vmem [resolvable:$true] %s132_s25 }
  0x1d   :  { %149 = vmatprep.subr.mxu0 %v231_v0  ;;  %s201_s26 = scalar_lea.vmem %s133_s25, 64  ;;  %p206_p11 = scmp.lt.s32.totalorder %s133_s25, %s133_s25 }
  0x1e   :  { %150 = vmatpush3.msra.mxu0 %v42_v2  ;;  %p202_p10 = scmp.ne.s32.totalorder %s133_s25, %s201_s26  ;;  %p207_p12 = scmp.lt.s32.totalorder %s201_s26, %s201_s26 }
  0x1f   :  { %152 = vmatmul.mubr.msk.f32.vlgmr.msra.gmra.mxu0 %vm51_vm1, %v41_v3 }
  0x20   :  { %p208_p13 = por %p207_p12, %p206_p11 }
  0x22   :  { %p209_p0 = pnand %p208_p13, %p202_p10 }
  0xdf   :  { %v121_v5 = vpop.f32.mrf.mxu0 }
  0xe0   :  { %v122_v6 = vadd.f32 %v142_v4, %v121_v5 }
  0xe1   :  { %v153_v7 = vpop.f32.mrf.mxu0 }
  0xe2   :  { %125 = vst [vmem:[#allocation7] sm:$0xf] %v122_v6 }
  0xe3   :  { %212 = shalt.err (!%p209_p0)
}
  0xe4   :  { %135 = dma.vmem_to_hbm [thread:$0]  %s133_s25, 64, %s269_s3, [#allocation4]  }
  0xe5   :  { %225 = dma.done.wait [#allocation4], 64  }
  0xe6   :  { %226 = vsyncadd [#allocation4], 4294967232 }
  0xe7   :  { %139 = vsyncpa [#allocation3], 1 }
  0xe8   :  { %140 = vsyncpa [#allocation6], 1 }
  0xe9   :  { %141 = vsyncpa [#allocation4], 1 }

</bundles_post_ra>
